<compile_context>
chip_gen: v5e
topology: v5e:2x2
jax: 0.10.0
libtpu: 0.0.40
codegen_flags: <defaults>
</compile_context>

<pallas_src>
import functools
import math

import jax
import jax.numpy as jnp
from jax.experimental import pallas as pl
from jax.experimental.pallas import tpu as pltpu


# ----------------------------------------------------------------------------
# Fused Pallas kernel: Conv2d + (Conv1d + Tanh)* for one tile of (batch*day)
# ----------------------------------------------------------------------------
def _make_fused_kernel(n_layers, layer_meta, R, PAD):
    """layer_meta: tuple of (kernel_size, row_step) per Conv1d layer.

    Ref order: x, w2d, b2d, (w_l, b_l)*n_layers, out, scratch_0..scratch_{n_layers-1}
    """

    def kernel(*refs):
        x_ref, w2d_ref, b2d_ref = refs[0], refs[1], refs[2]
        wb = refs[3:3 + 2 * n_layers]
        o_ref = refs[3 + 2 * n_layers]
        scratch = refs[4 + 2 * n_layers:]

        # Conv2d(1, C0, [H, 1]) == (R, H) @ (H, C0) + b, rows = flattened (b*d, w).
        act = jnp.dot(x_ref[...], w2d_ref[...],
                      preferred_element_type=jnp.float32) + b2d_ref[...]

        cur = scratch[0]
        cur[pl.ds(0, R), :] = act
        if PAD:
            cur[pl.ds(R, PAD), :] = jnp.zeros((PAD, cur.shape[1]), jnp.float32)

        for li in range(n_layers):
            kk, step = layer_meta[li]
            w_ref = wb[2 * li]        # (kk, Cin, Cout)
            b_ref = wb[2 * li + 1]    # (1, Cout)
            # Conv1d as a sum of kk statically row-shifted matmuls (dilated layout):
            # valid output position l lives at row l * (step * stride); garbage rows
            # in between are computed but never read.
            acc = jnp.dot(cur[pl.ds(0, R), :], w_ref[0],
                          preferred_element_type=jnp.float32) + b_ref[...]
            for j in range(1, kk):
                acc = acc + jnp.dot(cur[pl.ds(j * step, R), :], w_ref[j],
                                    preferred_element_type=jnp.float32)
            acc = jnp.tanh(acc)

            if li == n_layers - 1:
                o_ref[...] = acc.astype(o_ref.dtype)
            else:
                nxt = scratch[li + 1]
                nxt[pl.ds(0, R), :] = acc
                if PAD:
                    nxt[pl.ds(R, PAD), :] = jnp.zeros((PAD, acc.shape[1]),
                                                      jnp.float32)
                cur = nxt

    return kernel


# ----------------------------------------------------------------------------
# Parameter init matching the torch module's shapes
# ----------------------------------------------------------------------------
def init_params(key, in_height, out_chnls, kernel):
    params = {}
    k0, key = jax.random.split(key)
    c0 = out_chnls[0]
    # torch Conv2d(1, c0, [H, 1]) weight (c0, 1, H, 1) -> squeeze -> (c0, H)
    params["w2d"] = 0.1 * jax.random.normal(k0, (c0, in_height), jnp.float32)
    k0, key = jax.random.split(key)
    params["b2d"] = 0.1 * jax.random.normal(k0, (c0,), jnp.float32)

    conv1d = []
    cin = c0
    for i, cout in enumerate(out_chnls[1:]):
        kw, key = jax.random.split(key)
        w = 0.1 * jax.random.normal(kw, (cout, cin, kernel[i]), jnp.float32)
        kb, key = jax.random.split(key)
        b = 0.1 * jax.random.normal(kb, (cout,), jnp.float32)
        conv1d.append((w, b))
        cin = cout
    params["conv1d"] = conv1d
    return params


# ----------------------------------------------------------------------------
# InputConv forward: one fused pallas_call for all days and all conv layers
# ----------------------------------------------------------------------------
def input_conv_forward(inputs, params, *, in_height, in_width, input_day,
                       kernel, stride, block_bd=None):
    x = inputs.reshape(-1, input_day, in_height, in_width).astype(jnp.float32)
    B = x.shape[0]
    D = input_day
    BD = B * D
    H = in_height
    Lpad = in_width

    w2d = params["w2d"].astype(jnp.float32)           # (C0, H)
    b2d = params["b2d"].astype(jnp.float32)           # (C0,)
    C0 = w2d.shape[0]

    n_layers = len(params["conv1d"])
    assert n_layers >= 1, "module requires at least one Conv1d layer"

    # Layer bookkeeping for the dilated row layout.
    steps, chans = [], [C0]
    s_prod = 1
    for (wk, _), kk, ss in zip(params["conv1d"], kernel, stride):
        steps.append(s_prod)          # row step of this layer's input
        s_prod *= ss
        chans.append(wk.shape[0])
    Ls = [Lpad]
    for kk, ss in zip(kernel, stride):
        Ls.append((Ls[-1] - kk) // ss + 1)
    L_final = Ls[-1]
    C_last = chans[-1]
    PAD = max((kernel[i] - 1) * steps[i] for i in range(n_layers))

    # Batch*day tile size; keep R = block_bd * Lpad a multiple of 8 (sublane rule).
    align = 8 // math.gcd(Lpad, 8)
    if block_bd is None:
        block_bd = max(align, min(BD, 1024 // max(Lpad, 1)))
    block_bd = max(align, (block_bd // align) * align)
    BDp = ((BD + block_bd - 1) // block_bd) * block_bd
    R = block_bd * Lpad

    # One transpose over the whole (B*D, H, W) batch (not one per day):
    # rows = (b*d, w), lane dim = H for the Conv2d contraction.
    x3 = jnp.transpose(x.reshape(BD, H, Lpad), (0, 2, 1))            # (BD, W, H)
    if BDp != BD:
        x3 = jnp.concatenate(
            [x3, jnp.zeros((BDp - BD, Lpad, H), jnp.float32)], axis=0)
    x2d = x3.reshape(BDp * Lpad, H)

    operands = [x2d, jnp.transpose(w2d), b2d.reshape(1, C0)]
    in_specs = [
        pl.BlockSpec((R, H), lambda i: (i, 0)),
        pl.BlockSpec((H, C0), lambda i: (0, 0)),
        pl.BlockSpec((1, C0), lambda i: (0, 0)),
    ]
    layer_meta = []
    for li, ((wk, bk), kk) in enumerate(zip(params["conv1d"], kernel)):
        cout, cin, _ = wk.shape
        w_t = jnp.transpose(wk.astype(jnp.float32), (2, 1, 0))        # (kk, Cin, Cout)
        operands += [w_t, bk.astype(jnp.float32).reshape(1, cout)]
        in_specs += [
            pl.BlockSpec((kk, cin, cout), lambda i: (0, 0, 0)),
            pl.BlockSpec((1, cout), lambda i: (0, 0)),
        ]
        layer_meta.append((kk, steps[li]))

    grid = (BDp // block_bd,)
    scratch_shapes = [pltpu.VMEM((R + PAD, chans[i]), jnp.float32)
                      for i in range(n_layers)]

    # Advisory cost estimate for the XLA scheduler.
    flops = 2 * BDp * Lpad * H * C0
    trans = 0
    for li in range(n_layers):
        flops += 2 * BDp * Lpad * kernel[li] * chans[li] * chans[li + 1]
        trans += BDp * Lpad * chans[li + 1]
    bytes_accessed = 4 * (int(x2d.size)
                          + sum(int(o.size) for o in operands[1:])
                          + BDp * Lpad * C_last)

    out_full = pl.pallas_call(
        _make_fused_kernel(n_layers, tuple(layer_meta), R, PAD),
        out_shape=jax.ShapeDtypeStruct((BDp * Lpad, C_last), jnp.float32),
        grid=grid,
        in_specs=in_specs,
        out_specs=pl.BlockSpec((R, C_last), lambda i: (i, 0)),
        scratch_shapes=scratch_shapes,
        compiler_params=pltpu.CompilerParams(
            dimension_semantics=("parallel",)),
        cost_estimate=pl.CostEstimate(flops=int(flops),
                                      transcendentals=int(trans),
                                      bytes_accessed=int(bytes_accessed)),
    )(*operands)

    # Valid final positions live at dilated row offsets l * prod(stride) inside each
    # (batch, day) element's Lpad-row slab; tiny strided slice + free reshapes in glue.
    out = out_full.reshape(BDp, Lpad, C_last)[:BD, ::s_prod, :][:, :L_final, :]
    return out.reshape(B, D * L_final, C_last)


# ----------------------------------------------------------------------------
# Pure-JAX reference (correctness check)
# ----------------------------------------------------------------------------
def reference_forward(inputs, params, *, in_height, in_width, input_day,
                      kernel, stride):
    x = inputs.reshape(-1, input_day, in_height, in_width).astype(jnp.float32)
    w2d, b2d = params["w2d"], params["b2d"]
    outs = []
    for d in range(input_day):
        xd = x[:, d]
        out = jnp.einsum("ch,bhw->bwc", w2d, xd) + b2d
        for (wk, bk), kk, ss in zip(params["conv1d"], kernel, stride):
            L = out.shape[1]
            Lout = (L - kk) // ss + 1
            idx = jnp.arange(Lout)[:, None] * ss + jnp.arange(kk)[None, :]
            patches = out[:, idx, :]                      # (B, Lout, kk, Cin)
            out = jnp.tanh(jnp.einsum("blkc,ock->blo", patches, wk) + bk)
        outs.append(out)
    return jnp.concatenate(outs, axis=1)


if __name__ == "__main__":
    in_height, in_width = 16, 16
    input_day = 4
    out_chnls = [8, 16, 32]
    kernel = [3, 3]
    stride = [2, 1]
    batch = 2

    key = jax.random.PRNGKey(0)
    kp, kx = jax.random.split(key)
    params = init_params(kp, in_height, out_chnls, kernel)
    x = jax.random.normal(kx, (batch, input_day, in_height, in_width),
                          jnp.float32)

    # block_bd=2 -> grid of 4 batch*day tiles (exercises the pipelined parallel grid).
    fwd = jax.jit(functools.partial(
        input_conv_forward, in_height=in_height, in_width=in_width,
        input_day=input_day, kernel=kernel, stride=stride, block_bd=2))
    out = jax.block_until_ready(fwd(x, params))

    ref = jax.block_until_ready(reference_forward(
        x, params, in_height=in_height, in_width=in_width,
        input_day=input_day, kernel=kernel, stride=stride))

    L_final = in_width
    for kk, ss in zip(kernel, stride):
        L_final = (L_final - kk) // ss + 1
    assert out.shape == (batch, input_day * L_final, out_chnls[-1]), out.shape
    max_err = float(jnp.max(jnp.abs(out - ref)))
    assert jnp.allclose(out, ref, atol=1e-4, rtol=1e-4), f"mismatch {max_err}"
    print("KERNEL_OK")
</pallas_src>

<mosaic_0001>
module attributes {stable_mosaic.version = 11 : i64} {
  func.func @kernel(%arg0: i32, %arg1: memref<32x16xf32, #tpu.memory_space<vmem>>, %arg2: memref<16x8xf32, #tpu.memory_space<vmem>>, %arg3: memref<1x8xf32, #tpu.memory_space<vmem>>, %arg4: memref<3x8x16xf32, #tpu.memory_space<vmem>>, %arg5: memref<1x16xf32, #tpu.memory_space<vmem>>, %arg6: memref<3x16x32xf32, #tpu.memory_space<vmem>>, %arg7: memref<1x32xf32, #tpu.memory_space<vmem>>, %arg8: memref<32x32xf32, #tpu.memory_space<vmem>>, %arg9: memref<36x8xf32, #tpu.memory_space<vmem>>, %arg10: memref<36x16xf32, #tpu.memory_space<vmem>>) attributes {dimension_semantics = [#tpu.dimension_semantics<parallel>], iteration_bounds = array<i64: 4>, scalar_prefetch = 0 : i64, scratch_operands = 2 : i64, tpu.core_type = #tpu.core_type<tc>, window_params = [{transform_indices = @transform_0, window_bounds = array<i64: 32, 16>}, {pipeline_mode = #tpu.pipeline_mode<synchronous>, transform_indices = @transform_1, window_bounds = array<i64: 16, 8>}, {pipeline_mode = #tpu.pipeline_mode<synchronous>, transform_indices = @transform_2, window_bounds = array<i64: 1, 8>}, {pipeline_mode = #tpu.pipeline_mode<synchronous>, transform_indices = @transform_3, window_bounds = array<i64: 3, 8, 16>}, {pipeline_mode = #tpu.pipeline_mode<synchronous>, transform_indices = @transform_4, window_bounds = array<i64: 1, 16>}, {pipeline_mode = #tpu.pipeline_mode<synchronous>, transform_indices = @transform_5, window_bounds = array<i64: 3, 16, 32>}, {pipeline_mode = #tpu.pipeline_mode<synchronous>, transform_indices = @transform_6, window_bounds = array<i64: 1, 32>}, {transform_indices = @transform_7, window_bounds = array<i64: 32, 32>}]} {
    %c0 = arith.constant 0 : index
    %c0_0 = arith.constant 0 : index
    %0 = vector.load %arg1[%c0, %c0_0] : memref<32x16xf32, #tpu.memory_space<vmem>>, vector<32x16xf32>
    %c0_1 = arith.constant 0 : index
    %c0_2 = arith.constant 0 : index
    %1 = vector.load %arg2[%c0_1, %c0_2] : memref<16x8xf32, #tpu.memory_space<vmem>>, vector<16x8xf32>
    %cst = arith.constant dense<0.000000e+00> : vector<32x8xf32>
    %2 = tpu.matmul %0, %1, %cst {dimension_numbers = #tpu.dot_dimension_numbers<[1], [0], [0], [1], [0, 0, 1, 1], [], []>} : vector<32x16xf32>, vector<16x8xf32>, vector<32x8xf32> -> vector<32x8xf32>
    %c0_3 = arith.constant 0 : index
    %c0_4 = arith.constant 0 : index
    %3 = vector.load %arg3[%c0_3, %c0_4] : memref<1x8xf32, #tpu.memory_space<vmem>>, vector<1x8xf32>
    %4 = vector.broadcast %3 : vector<1x8xf32> to vector<32x8xf32>
    %5 = arith.addf %2, %4 : vector<32x8xf32>
    %c0_5 = arith.constant 0 : index
    %c0_6 = arith.constant 0 : index
    %6 = vector.load %arg9[%c0_5, %c0_6] : memref<36x8xf32, #tpu.memory_space<vmem>>, vector<32x8xf32>
    tpu.vector_store %arg9[%c0_5, %c0_6], %5 {strides = array<i32>} : memref<36x8xf32, #tpu.memory_space<vmem>>, vector<32x8xf32>,
    %cst_7 = arith.constant 0.000000e+00 : f32
    %7 = vector.broadcast %cst_7 : f32 to vector<4x8xf32>
    %c32 = arith.constant 32 : index
    %c0_8 = arith.constant 0 : index
    %8 = vector.load %arg9[%c32, %c0_8] : memref<36x8xf32, #tpu.memory_space<vmem>>, vector<4x8xf32>
    tpu.vector_store %arg9[%c32, %c0_8], %7 {strides = array<i32>} : memref<36x8xf32, #tpu.memory_space<vmem>>, vector<4x8xf32>,
    %c0_9 = arith.constant 0 : index
    %c0_10 = arith.constant 0 : index
    %9 = vector.load %arg9[%c0_9, %c0_10] : memref<36x8xf32, #tpu.memory_space<vmem>>, vector<32x8xf32>
    %c0_11 = arith.constant 0 : index
    %c0_12 = arith.constant 0 : index
    %c0_13 = arith.constant 0 : index
    %10 = vector.load %arg4[%c0_11, %c0_12, %c0_13] : memref<3x8x16xf32, #tpu.memory_space<vmem>>, vector<1x8x16xf32>
    %11 = vector.shape_cast %10 : vector<1x8x16xf32> to vector<8x16xf32>
    %cst_14 = arith.constant dense<0.000000e+00> : vector<32x16xf32>
    %12 = tpu.matmul %9, %11, %cst_14 {dimension_numbers = #tpu.dot_dimension_numbers<[1], [0], [0], [1], [0, 0, 1, 1], [], []>} : vector<32x8xf32>, vector<8x16xf32>, vector<32x16xf32> -> vector<32x16xf32>
    %c0_15 = arith.constant 0 : index
    %c0_16 = arith.constant 0 : index
    %13 = vector.load %arg5[%c0_15, %c0_16] : memref<1x16xf32, #tpu.memory_space<vmem>>, vector<1x16xf32>
    %14 = vector.broadcast %13 : vector<1x16xf32> to vector<32x16xf32>
    %15 = arith.addf %12, %14 : vector<32x16xf32>
    %c1 = arith.constant 1 : index
    %c0_17 = arith.constant 0 : index
    %16 = vector.load %arg9[%c1, %c0_17] : memref<36x8xf32, #tpu.memory_space<vmem>>, vector<32x8xf32>
    %c1_18 = arith.constant 1 : index
    %c0_19 = arith.constant 0 : index
    %c0_20 = arith.constant 0 : index
    %17 = vector.load %arg4[%c1_18, %c0_19, %c0_20] : memref<3x8x16xf32, #tpu.memory_space<vmem>>, vector<1x8x16xf32>
    %18 = vector.shape_cast %17 : vector<1x8x16xf32> to vector<8x16xf32>
    %cst_21 = arith.constant dense<0.000000e+00> : vector<32x16xf32>
    %19 = tpu.matmul %16, %18, %cst_21 {dimension_numbers = #tpu.dot_dimension_numbers<[1], [0], [0], [1], [0, 0, 1, 1], [], []>} : vector<32x8xf32>, vector<8x16xf32>, vector<32x16xf32> -> vector<32x16xf32>
    %20 = arith.addf %15, %19 : vector<32x16xf32>
    %c2 = arith.constant 2 : index
    %c0_22 = arith.constant 0 : index
    %21 = vector.load %arg9[%c2, %c0_22] : memref<36x8xf32, #tpu.memory_space<vmem>>, vector<32x8xf32>
    %c2_23 = arith.constant 2 : index
    %c0_24 = arith.constant 0 : index
    %c0_25 = arith.constant 0 : index
    %22 = vector.load %arg4[%c2_23, %c0_24, %c0_25] : memref<3x8x16xf32, #tpu.memory_space<vmem>>, vector<1x8x16xf32>
    %23 = vector.shape_cast %22 : vector<1x8x16xf32> to vector<8x16xf32>
    %cst_26 = arith.constant dense<0.000000e+00> : vector<32x16xf32>
    %24 = tpu.matmul %21, %23, %cst_26 {dimension_numbers = #tpu.dot_dimension_numbers<[1], [0], [0], [1], [0, 0, 1, 1], [], []>} : vector<32x8xf32>, vector<8x16xf32>, vector<32x16xf32> -> vector<32x16xf32>
    %25 = arith.addf %20, %24 : vector<32x16xf32>
    %26 = math.tanh %25 : vector<32x16xf32>
    %c0_27 = arith.constant 0 : index
    %c0_28 = arith.constant 0 : index
    %27 = vector.load %arg10[%c0_27, %c0_28] : memref<36x16xf32, #tpu.memory_space<vmem>>, vector<32x16xf32>
    tpu.vector_store %arg10[%c0_27, %c0_28], %26 {strides = array<i32>} : memref<36x16xf32, #tpu.memory_space<vmem>>, vector<32x16xf32>,
    %cst_29 = arith.constant 0.000000e+00 : f32
    %28 = vector.broadcast %cst_29 : f32 to vector<4x16xf32>
    %c32_30 = arith.constant 32 : index
    %c0_31 = arith.constant 0 : index
    %29 = vector.load %arg10[%c32_30, %c0_31] : memref<36x16xf32, #tpu.memory_space<vmem>>, vector<4x16xf32>
    tpu.vector_store %arg10[%c32_30, %c0_31], %28 {strides = array<i32>} : memref<36x16xf32, #tpu.memory_space<vmem>>, vector<4x16xf32>,
    %c0_32 = arith.constant 0 : index
    %c0_33 = arith.constant 0 : index
    %30 = vector.load %arg10[%c0_32, %c0_33] : memref<36x16xf32, #tpu.memory_space<vmem>>, vector<32x16xf32>
    %c0_34 = arith.constant 0 : index
    %c0_35 = arith.constant 0 : index
    %c0_36 = arith.constant 0 : index
    %31 = vector.load %arg6[%c0_34, %c0_35, %c0_36] : memref<3x16x32xf32, #tpu.memory_space<vmem>>, vector<1x16x32xf32>
    %32 = vector.shape_cast %31 : vector<1x16x32xf32> to vector<16x32xf32>
    %cst_37 = arith.constant dense<0.000000e+00> : vector<32x32xf32>
    %33 = tpu.matmul %30, %32, %cst_37 {dimension_numbers = #tpu.dot_dimension_numbers<[1], [0], [0], [1], [0, 0, 1, 1], [], []>} : vector<32x16xf32>, vector<16x32xf32>, vector<32x32xf32> -> vector<32x32xf32>
    %c0_38 = arith.constant 0 : index
    %c0_39 = arith.constant 0 : index
    %34 = vector.load %arg7[%c0_38, %c0_39] : memref<1x32xf32, #tpu.memory_space<vmem>>, vector<1x32xf32>
    %35 = vector.broadcast %34 : vector<1x32xf32> to vector<32x32xf32>
    %36 = arith.addf %33, %35 : vector<32x32xf32>
    %c2_40 = arith.constant 2 : index
    %c0_41 = arith.constant 0 : index
    %37 = vector.load %arg10[%c2_40, %c0_41] : memref<36x16xf32, #tpu.memory_space<vmem>>, vector<32x16xf32>
    %c1_42 = arith.constant 1 : index
    %c0_43 = arith.constant 0 : index
    %c0_44 = arith.constant 0 : index
    %38 = vector.load %arg6[%c1_42, %c0_43, %c0_44] : memref<3x16x32xf32, #tpu.memory_space<vmem>>, vector<1x16x32xf32>
    %39 = vector.shape_cast %38 : vector<1x16x32xf32> to vector<16x32xf32>
    %cst_45 = arith.constant dense<0.000000e+00> : vector<32x32xf32>
    %40 = tpu.matmul %37, %39, %cst_45 {dimension_numbers = #tpu.dot_dimension_numbers<[1], [0], [0], [1], [0, 0, 1, 1], [], []>} : vector<32x16xf32>, vector<16x32xf32>, vector<32x32xf32> -> vector<32x32xf32>
    %41 = arith.addf %36, %40 : vector<32x32xf32>
    %c4 = arith.constant 4 : index
    %c0_46 = arith.constant 0 : index
    %42 = vector.load %arg10[%c4, %c0_46] : memref<36x16xf32, #tpu.memory_space<vmem>>, vector<32x16xf32>
    %c2_47 = arith.constant 2 : index
    %c0_48 = arith.constant 0 : index
    %c0_49 = arith.constant 0 : index
    %43 = vector.load %arg6[%c2_47, %c0_48, %c0_49] : memref<3x16x32xf32, #tpu.memory_space<vmem>>, vector<1x16x32xf32>
    %44 = vector.shape_cast %43 : vector<1x16x32xf32> to vector<16x32xf32>
    %cst_50 = arith.constant dense<0.000000e+00> : vector<32x32xf32>
    %45 = tpu.matmul %42, %44, %cst_50 {dimension_numbers = #tpu.dot_dimension_numbers<[1], [0], [0], [1], [0, 0, 1, 1], [], []>} : vector<32x16xf32>, vector<16x32xf32>, vector<32x32xf32> -> vector<32x32xf32>
    %46 = arith.addf %41, %45 : vector<32x32xf32>
    %47 = math.tanh %46 : vector<32x32xf32>
    %c0_51 = arith.constant 0 : index
    %c0_52 = arith.constant 0 : index
    %48 = vector.load %arg8[%c0_51, %c0_52] : memref<32x32xf32, #tpu.memory_space<vmem>>, vector<32x32xf32>
    tpu.vector_store %arg8[%c0_51, %c0_52], %47 {strides = array<i32>} : memref<32x32xf32, #tpu.memory_space<vmem>>, vector<32x32xf32>,
    return
  }
  func.func @transform_0(%arg0: i32) -> (i32, i32) {
    %c0_i32 = arith.constant 0 : i32
    %c0_i32_0 = arith.constant 0 : i32
    return %arg0, %c0_i32 : i32, i32
  }
  func.func @transform_1(%arg0: i32) -> (i32, i32) {
    %c0_i32 = arith.constant 0 : i32
    %c0_i32_0 = arith.constant 0 : i32
    %c0_i32_1 = arith.constant 0 : i32
    return %c0_i32, %c0_i32_0 : i32, i32
  }
  func.func @transform_2(%arg0: i32) -> (i32, i32) {
    %c0_i32 = arith.constant 0 : i32
    %c0_i32_0 = arith.constant 0 : i32
    %c0_i32_1 = arith.constant 0 : i32
    return %c0_i32, %c0_i32_0 : i32, i32
  }
  func.func @transform_3(%arg0: i32) -> (i32, i32, i32) {
    %c0_i32 = arith.constant 0 : i32
    %c0_i32_0 = arith.constant 0 : i32
    %c0_i32_1 = arith.constant 0 : i32
    %c0_i32_2 = arith.constant 0 : i32
    return %c0_i32, %c0_i32_0, %c0_i32_1 : i32, i32, i32
  }
  func.func @transform_4(%arg0: i32) -> (i32, i32) {
    %c0_i32 = arith.constant 0 : i32
    %c0_i32_0 = arith.constant 0 : i32
    %c0_i32_1 = arith.constant 0 : i32
    return %c0_i32, %c0_i32_0 : i32, i32
  }
  func.func @transform_5(%arg0: i32) -> (i32, i32, i32) {
    %c0_i32 = arith.constant 0 : i32
    %c0_i32_0 = arith.constant 0 : i32
    %c0_i32_1 = arith.constant 0 : i32
    %c0_i32_2 = arith.constant 0 : i32
    return %c0_i32, %c0_i32_0, %c0_i32_1 : i32, i32, i32
  }
  func.func @transform_6(%arg0: i32) -> (i32, i32) {
    %c0_i32 = arith.constant 0 : i32
    %c0_i32_0 = arith.constant 0 : i32
    %c0_i32_1 = arith.constant 0 : i32
    return %c0_i32, %c0_i32_0 : i32, i32
  }
  func.func @transform_7(%arg0: i32) -> (i32, i32) {
    %c0_i32 = arith.constant 0 : i32
    %c0_i32_0 = arith.constant 0 : i32
    return %arg0, %c0_i32 : i32, i32
  }
}

</mosaic_0001>

<bundles_post_ra>
// kernel: input_conv_forward.1
= control target key start
LH: loop header
LB: loop body
LE: loop exit
PB: predicated region body
PF: predicated region fallthrough
CT: control target
= control target key end

     0   :  { %s848_s24 = smov 0   ;;  %s954_s0 = inlined_call_operand.vmem [shape: f32[128,16], index: 0, kind: input, shape index: {}]   ;;  %s955_s1 = inlined_call_operand.vmem [shape: f32[16,8], index: 1, kind: input, shape index: {}]   ;;  %s956_s2 = inlined_call_operand.vmem [shape: f32[1,8], index: 2, kind: input, shape index: {}]   ;;  %s957_s3 = inlined_call_operand.vmem [shape: f32[3,8,16], index: 3, kind: input, shape index: {}]   ;;  %s958_s4 = inlined_call_operand.vmem [shape: f32[1,16], index: 4, kind: input, shape index: {}]   ;;  %s959_s5 = inlined_call_operand.vmem [shape: f32[3,16,32], index: 5, kind: input, shape index: {}]   ;;  %s960_s6 = inlined_call_operand.vmem [shape: f32[1,32], index: 6, kind: input, shape index: {}]   ;;  %s961_s7 = inlined_call_operand.vmem [shape: f32[128,32], index: 7, kind: output, shape index: {}]  }
   0x1 LB: > { %s723_s25 = sadd.s32 4294967295, %s805_s24   ;;  %p727_p0 = scmp.ge.s32.totalorder %s805_s24, 1  ;;  %s805_s24 = sphi %s848_s24, %s17_s24  }
   0x2   : > { %p238_p1 = scmp.lt.s32.totalorder %s805_s24, 5 }
   0x4   : > { %p239_p2 = pnand %p727_p0, %p238_p1 }
   0x5   : > { %s728_s30 = sshll.u32 (!%p239_p2), %s723_s25, 2 }
   0x6   : > { %242 = sbr.rel (%p239_p2) target bundleno = 488 (0x1e8), region = 48  ;;  %p271_p3 = scmp.lt.s32.totalorder (!%p239_p2), %s728_s30, 15 }
   0xb   : > { %v287_v0 = vld [vmem:[%s955_s1 + $0x8] sm:$0xff]  ;;  %v286_v1 = vld [vmem:[%s955_s1] sm:$0xff]  ;;  %s963_s30 = smov (!%p271_p3, %s728_s30), 15  ;;  %vm292_vm0 = vcmask 130048   ;;  %v745_v8 = vld [vmem:[%s957_s3 + $0x10] sm:$0xff]  ;;  %vm339_vm1 = vcmask 60416  }
   0xc   : > { %v345_v2 = vld [vmem:[%s957_s3] sm:$0xff]  ;;  %319 = vmatpush.msra.mxu0 %v287_v0  ;;  %s729_s10 = sshll.u32 %s963_s30, 3  ;;  %v740_v7 = vld [vmem:[%s957_s3 + $0x8] sm:$0xff]  ;;  %770 = vmatpush.msra.mxu3 %v745_v8  ;;  %v807_v9 = vmov 0.0   ;;  %vm334_vm2 = vcmask 64512   ;;  %v755_v31 = vld [vmem:[%s959_s5 + $0x18] sm:$0xff] }
   0xd   : > { %768 = vmatpush.msra.mxu1 %v345_v2  ;;  %s274_s13 = scalar_lea.vmem %s954_s0, %s729_s10  ;;  %769 = vmatpush.msra.mxu2 %v740_v7  ;;  %340 = vst.msk [vmem:[#allocation2 + $0x20] sm:$0xf] %vm339_vm1, %v807_v9  ;;  %v780_v10 = vld [vmem:[%s956_s2] ss:$0 sm:$0xff]  ;;  %v761_v32 = vld [vmem:[%s959_s5 + $0x28] sm:$0xff]  ;;  %v754_v37 = vld [vmem:[%s959_s5 + $0x10] sm:$0xff]  ;;  %s280_s18 = scalar_lea.vmem %s961_s7, %s729_s10 }
   0xe   : > { %320 = vmatpush.msra.mxu0 %v286_v1  ;;  %v282_v3 = vld [vmem:[%s274_s13] sm:$0xff]  ;;  %v283_v4 = vld [vmem:[%s274_s13 + $0x8] sm:$0xff]  ;;  %v284_v5 = vld [vmem:[%s274_s13 + $0x10] sm:$0xff]  ;;  %639 = vmatpush.msrb.mxu3 %v761_v32  ;;  %vm501_vm3 = vcmask 125952   ;;  %vm662_vm4 = vcmask 261120  }
   0xf   : > { %732 = vmatmul.msk.f32.vlgmr.msra.gmra.mxu0 %vm292_vm0, %v282_v3  ;;  %v285_v6 = vld [vmem:[%s274_s13 + $0x18] sm:$0xff]  ;;  %587 = vmatpush.msrb.mxu2 %v755_v31  ;;  %v508_v33 = vld [vmem:[%s959_s5 + $0x8] sm:$0xff]  ;;  %v507_v35 = vld [vmem:[%s959_s5] sm:$0xff]  ;;  %502 = vst.msk [vmem:[#allocation3 + $0x20] sm:$0xf] %vm501_vm3, %v807_v9 }
  0x10   : > { %377 = vmatpush.msrb.mxu0 %v345_v2  ;;  %539 = vmatpush.msrb.mxu1 %v508_v33  ;;  %v760_v38 = vld [vmem:[%s959_s5 + $0x20] sm:$0xff] }
  0x11   : > { %v781_v39 = vld [vmem:[%s958_s4] ss:$0 sm:$0xff]  ;;  %588 = vmatpush.msrb.mxu2 %v754_v37  ;;  %640 = vmatpush.msrb.mxu3 %v760_v38 }
  0x12   : > { %424 = vmatpush.msra.mxu0 %v740_v7  ;;  %540 = vmatpush.msrb.mxu1 %v507_v35 }
  0x17   : > { %733 = vmatmul.msk.f32.gmra.mxu0 %vm292_vm0, %v283_v4 }
  0x1f   : > { %734 = vmatmul.msk.f32.gmra.mxu0 %vm292_vm0, %v284_v5 }
  0x27   : > { %735 = vmatmul.msk.f32.gmra.mxu0 %vm292_vm0, %v285_v6 }
  0x8c   : > { %v322_v11 = vpop.f32.mrf.mxu0 }
  0x8d   : > { %v323_v12 = vadd.f32 %v780_v10, %v322_v11 }
  0x8f   : > { %335 = vst.msk [vmem:[#allocation2] sm:$0xff] %vm334_vm2, %v323_v12 }
  0x94   : > { %v325_v13 = vpop.f32.mrf.mxu0 }
  0x95   : > { %v326_v14 = vadd.f32 %v780_v10, %v325_v13 }
  0x96   : > { %v341_v15 = vld [vmem:[#allocation2] sm:$0xff] }
  0x97   : > { %336 = vst.msk [vmem:[#allocation2 + $0x8] sm:$0xff] %vm334_vm2, %v326_v14  ;;  %736 = vmatmul.msk.f32.vlgmr.msrb.gmra.mxu0 %vm334_vm2, %v341_v15  ;;  %v782_v15 = vld [vmem:[%s960_s6] ss:$0 sm:$0xff] }
  0x98   : > { %475 = vmatpush.msrb.mxu0 %v745_v8 }
  0x9c   : > { %v328_v16 = vpop.f32.mrf.mxu0 }
  0x9d   : > { %v329_v17 = vadd.f32 %v780_v10, %v328_v16 }
  0x9e   : > { %v342_v18 = vld [vmem:[#allocation2 + $0x8] sm:$0xff] }
  0x9f   : > { %v391_v19 = vld [vmem:[#allocation2 + $0x1] sm:$0xff]  ;;  %337 = vst.msk [vmem:[#allocation2 + $0x10] sm:$0xff] %vm334_vm2, %v329_v17  ;;  %737 = vmatmul.msk.f32.vlgmr.msra.gmra.mxu1 %vm334_vm2, %v342_v18 }
  0xa0   : > { %741 = vmatmul.msk.f32.vlgmr.msra.gmra.mxu0 %vm334_vm2, %v391_v19  ;;  %v442_v25 = vld [vmem:[#allocation2 + $0x2] sm:$0xff] }
  0xa4   : > { %v331_v20 = vpop.f32.mrf.mxu0 }
  0xa5   : > { %v332_v21 = vadd.f32 %v780_v10, %v331_v20 }
  0xa6   : > { %v343_v22 = vld [vmem:[#allocation2 + $0x10] sm:$0xff] }
  0xa7   : > { %v392_v23 = vld [vmem:[#allocation2 + $0x9] sm:$0xff]  ;;  %338 = vst.msk [vmem:[#allocation2 + $0x18] sm:$0xff] %vm334_vm2, %v332_v21  ;;  %738 = vmatmul.msk.f32.gmra.mxu1 %vm334_vm2, %v343_v22 }
  0xa8   : > { %v443_v24 = vld [vmem:[#allocation2 + $0xa] sm:$0xff]  ;;  %742 = vmatmul.msk.f32.vlgmr.msra.gmra.mxu2 %vm334_vm2, %v392_v23  ;;  %746 = vmatmul.msk.f32.vlgmr.msrb.gmra.mxu0 %vm334_vm2, %v442_v25 }
  0xa9   : > { %747 = vmatmul.msk.f32.vlgmr.msra.gmra.mxu3 %vm334_vm2, %v443_v24 }
  0xae   : > { %v344_v26 = vld [vmem:[#allocation2 + $0x18] sm:$0xff] }
  0xaf   : > { %v393_v27 = vld [vmem:[#allocation2 + $0x11] sm:$0xff]  ;;  %739 = vmatmul.msk.f32.gmra.mxu1 %vm334_vm2, %v344_v26  ;;  %v394_v29 = vld [vmem:[#allocation2 + $0x19] sm:$0xff] }
  0xb0   : > { %v444_v28 = vld [vmem:[#allocation2 + $0x12] sm:$0xff]  ;;  %743 = vmatmul.msk.f32.gmra.mxu2 %vm334_vm2, %v393_v27  ;;  %v445_v30 = vld [vmem:[#allocation2 + $0x1a] sm:$0xff] }
  0xb1   : > { %748 = vmatmul.msk.f32.gmra.mxu3 %vm334_vm2, %v444_v28 }
  0xb8   : > { %744 = vmatmul.msk.f32.gmra.mxu2 %vm334_vm2, %v394_v29 }
  0xb9   : > { %749 = vmatmul.msk.f32.gmra.mxu3 %vm334_vm2, %v445_v30 }
 0x114   : > { %v379_v34 = vpop.f32.mrf.mxu0 }
 0x115   : > { %v380_v40 = vadd.f32 %v781_v39, %v379_v34 }
 0x11c   : > { %v382_v41 = vpop.f32.mrf.mxu1 }
 0x11d   : > { %v426_v36 = vpop.f32.mrf.mxu0  ;;  %v383_v45 = vadd.f32 %v781_v39, %v382_v41 }
 0x11e   : > { %v438_v42 = vadd.f32 %v426_v36, %v380_v40 }
 0x124   : > { %v385_v49 = vpop.f32.mrf.mxu1 }
 0x125   : > { %v477_v43 = vpop.f32.mrf.mxu0  ;;  %v386_v52 = vadd.f32 %v781_v39, %v385_v49 }
 0x126   : > { %v489_v44 = vadd.f32 %v477_v43, %v438_v42 }
 0x128   : > { %783 = vtanh.f32 %v489_v44 }
 0x12b   : > { %v429_v46 = vpop.f32.mrf.mxu2 }
 0x12c   : > { %v439_v47 = vadd.f32 %v429_v46, %v383_v45  ;;  %v480_v48 = vpop.f32.mrf.mxu3  ;;  %v388_v58 = vpop.f32.mrf.mxu1 }
 0x12d   : > { %v389_v60 = vadd.f32 %v781_v39, %v388_v58 }
 0x12e   : > { %v490_v50 = vadd.f32 %v480_v48, %v439_v47  ;;  %v784_v51 = vpop.eup %783 }
 0x12f   : > { %497 = vst.msk [vmem:[#allocation3] sm:$0xff] %vm292_vm0, %v784_v51 }
 0x130   : > { %785 = vtanh.f32 %v490_v50 }
 0x133   : > { %v432_v53 = vpop.f32.mrf.mxu2 }
 0x134   : > { %v440_v54 = vadd.f32 %v432_v53, %v386_v52  ;;  %v483_v55 = vpop.f32.mrf.mxu3 }
 0x136   : > { %v786_v56 = vpop.eup %785  ;;  %v491_v57 = vadd.f32 %v483_v55, %v440_v54  ;;  %v503_v59 = vld [vmem:[#allocation3] sm:$0xff] }
 0x137   : > { %498 = vst.msk [vmem:[#allocation3 + $0x8] sm:$0xff] %vm292_vm0, %v786_v56  ;;  %750 = vmatmul.msk.f32.vlgmr.msrb.gmra.mxu1 %vm292_vm0, %v503_v59 }
 0x138   : > { %787 = vtanh.f32 %v491_v57 }
 0x13b   : > { %v435_v61 = vpop.f32.mrf.mxu2 }
 0x13c   : > { %v441_v62 = vadd.f32 %v435_v61, %v389_v60  ;;  %v486_v63 = vpop.f32.mrf.mxu3 }
 0x13e   : > { %v788_v0 = vpop.eup %787  ;;  %v492_v1 = vadd.f32 %v486_v63, %v441_v62  ;;  %v504_v2 = vld [vmem:[#allocation3 + $0x8] sm:$0xff] }
 0x13f   : > { %v554_v3 = vld [vmem:[#allocation3 + $0x2] sm:$0xff]  ;;  %499 = vst.msk [vmem:[#allocation3 + $0x10] sm:$0xff] %vm292_vm0, %v788_v0  ;;  %751 = vmatmul.msk.f32.gmra.mxu1 %vm292_vm0, %v504_v2 }
 0x140   : > { %v606_v4 = vld [vmem:[#allocation3 + $0x4] sm:$0xff]  ;;  %756 = vmatmul.msk.f32.vlgmr.msrb.gmra.mxu2 %vm292_vm0, %v554_v3  ;;  %789 = vtanh.f32 %v492_v1 }
 0x141   : > { %762 = vmatmul.msk.f32.vlgmr.msrb.gmra.mxu3 %vm292_vm0, %v606_v4 }
 0x146   : > { %v790_v5 = vpop.eup %789  ;;  %v505_v6 = vld [vmem:[#allocation3 + $0x10] sm:$0xff] }
 0x147   : > { %v555_v7 = vld [vmem:[#allocation3 + $0xa] sm:$0xff]  ;;  %500 = vst.msk [vmem:[#allocation3 + $0x18] sm:$0xff] %vm292_vm0, %v790_v5  ;;  %752 = vmatmul.msk.f32.gmra.mxu1 %vm292_vm0, %v505_v6 }
 0x148   : > { %v607_v8 = vld [vmem:[#allocation3 + $0xc] sm:$0xff]  ;;  %757 = vmatmul.msk.f32.gmra.mxu2 %vm292_vm0, %v555_v7 }
 0x149   : > { %763 = vmatmul.msk.f32.gmra.mxu3 %vm292_vm0, %v607_v8 }
 0x14e   : > { %v506_v9 = vld [vmem:[#allocation3 + $0x18] sm:$0xff] }
 0x14f   : > { %v556_v10 = vld [vmem:[#allocation3 + $0x12] sm:$0xff]  ;;  %753 = vmatmul.msk.f32.gmra.mxu1 %vm292_vm0, %v506_v9  ;;  %v557_v12 = vld [vmem:[#allocation3 + $0x1a] sm:$0xff] }
 0x150   : > { %v608_v11 = vld [vmem:[#allocation3 + $0x14] sm:$0xff]  ;;  %758 = vmatmul.msk.f32.gmra.mxu2 %vm292_vm0, %v556_v10  ;;  %v609_v13 = vld [vmem:[#allocation3 + $0x1c] sm:$0xff] }
 0x151   : > { %764 = vmatmul.msk.f32.gmra.mxu3 %vm292_vm0, %v608_v11 }
 0x158   : > { %759 = vmatmul.msk.f32.gmra.mxu2 %vm292_vm0, %v557_v12 }
 0x159   : > { %765 = vmatmul.msk.f32.gmra.mxu3 %vm292_vm0, %v609_v13 }
 0x1b4   : > { %v542_v14 = vpop.f32.mrf.mxu1 }
 0x1b5   : > { %v543_v16 = vadd.f32 %v782_v15, %v542_v14 }
 0x1bc   : > { %v545_v17 = vpop.f32.mrf.mxu1 }
 0x1bd   : > { %v546_v22 = vadd.f32 %v782_v15, %v545_v17 }
 0x1c3   : > { %v590_v18 = vpop.f32.mrf.mxu2 }
 0x1c4   : > { %v642_v19 = vpop.f32.mrf.mxu3  ;;  %v602_v20 = vadd.f32 %v590_v18, %v543_v16  ;;  %v548_v26 = vpop.f32.mrf.mxu1 }
 0x1c5   : > { %v549_v29 = vadd.f32 %v782_v15, %v548_v26 }
 0x1c6   : > { %v654_v21 = vadd.f32 %v642_v19, %v602_v20 }
 0x1c8   : > { %791 = vtanh.f32 %v654_v21 }
 0x1cb   : > { %v593_v23 = vpop.f32.mrf.mxu2 }
 0x1cc   : > { %v645_v24 = vpop.f32.mrf.mxu3  ;;  %v603_v25 = vadd.f32 %v593_v23, %v546_v22  ;;  %v551_v35 = vpop.f32.mrf.mxu1 }
 0x1cd   : > { %v552_v36 = vadd.f32 %v782_v15, %v551_v35 }
 0x1ce   : > { %v792_v27 = vpop.eup %791  ;;  %v655_v28 = vadd.f32 %v645_v24, %v603_v25 }
 0x1cf   : > { %663 = vst.msk [vmem:[%s280_s18] sm:$0xff] %vm662_vm4, %v792_v27 }
 0x1d0   : > { %793 = vtanh.f32 %v655_v28 }
 0x1d3   : > { %v596_v30 = vpop.f32.mrf.mxu2 }
 0x1d4   : > { %v648_v31 = vpop.f32.mrf.mxu3  ;;  %v604_v32 = vadd.f32 %v596_v30, %v549_v29 }
 0x1d6   : > { %v794_v33 = vpop.eup %793  ;;  %v656_v34 = vadd.f32 %v648_v31, %v604_v32 }
 0x1d7   : > { %664 = vst.msk [vmem:[%s280_s18 + $0x8] sm:$0xff] %vm662_vm4, %v794_v33 }
 0x1d8   : > { %795 = vtanh.f32 %v656_v34 }
 0x1db   : > { %v599_v37 = vpop.f32.mrf.mxu2 }
 0x1dc   : > { %v605_v38 = vadd.f32 %v599_v37, %v552_v36  ;;  %v651_v39 = vpop.f32.mrf.mxu3 }
 0x1de   : > { %v796_v40 = vpop.eup %795  ;;  %v657_v41 = vadd.f32 %v651_v39, %v605_v38 }
 0x1df   : > { %665 = vst.msk [vmem:[%s280_s18 + $0x10] sm:$0xff] %vm662_vm4, %v796_v40 }
 0x1e0   : > { %797 = vtanh.f32 %v657_v41 }
 0x1e6   : > { %v798_v42 = vpop.eup %797 }
 0x1e7   : > { %666 = vst.msk [vmem:[%s280_s18 + $0x18] sm:$0xff] %vm662_vm4, %v798_v42 }
 0x1e8 PF: > { %s17_s24 = sadd.s32 1, %s805_s24  }
 0x1e9   : > { %p14_p4 = scmp.ge.s32.totalorder %s17_s24, 6  }
 0x1eb   :  { %16 = sbr.rel (!%p14_p4) target bundleno = 1 (0x1), region = 82 }

</bundles_post_ra>
